<compile_context>
chip_gen: v6e
topology: v6e:2x2x1
jax: 0.10.0
libtpu: 0.0.40
codegen_flags: <defaults>
</compile_context>

<pallas_src>
import math

import jax
import jax.numpy as jnp
from jax.experimental import pallas as pl
from jax.experimental.pallas import tpu as pltpu

PRIOR_DIM = 3
PRIOR_DIM_PAD = 8            # prior zero-padded to 8 lanes so layer 1 can use the MXU
HIDDEN_DIM = 128
OUTPUT_DIM = 384
LN_EPS = 1e-5                # nn.LayerNorm default


def _round_up(x, m):
    return ((x + m - 1) // m) * m


def _layernorm(h, gamma, beta):
    # Two-pass variance (E[(x-mean)^2]) in f32 — numerically safe; rsqrt -> EUP.
    mean = jnp.mean(h, axis=-1, keepdims=True)
    c = h - mean
    var = jnp.mean(c * c, axis=-1, keepdims=True)
    return c * jax.lax.rsqrt(var + LN_EPS) * gamma + beta


def clinical_prior_encoder_kernel(
    x_ref,                    # [TB, 8]    f32 (columns 3..7 zero)
    w1_ref, aux1_ref,         # [8, 128]   f32 (rows 3..7 zero) ; [3, 128] f32 (bias, gamma, beta)
    w2_ref, aux2_ref,         # [128, 256] bf16 ; [3, 256] f32
    w3_ref, aux3_ref,         # [256, 384] bf16 ; [3, 384] f32
    o_ref,                    # [TB, 384]
):
    x = x_ref[...]                            # [TB, 8] f32

    # --- Block 1: Linear(3 -> 128) on the (otherwise idle) MXU ---
    b1 = aux1_ref[0:1, :]
    g1 = aux1_ref[1:2, :]
    be1 = aux1_ref[2:3, :]
    h = jnp.dot(x, w1_ref[...], preferred_element_type=jnp.float32) + b1
    h = _layernorm(h, g1, be1)
    h = jnp.maximum(h, 0.0)
    # TODO(synk): Dropout is identity in eval mode; training-mode RNG masking omitted.

    # --- Block 2: Linear(128 -> 256) bf16 MXU matmul, f32 accumulate + LN + ReLU ---
    b2 = aux2_ref[0:1, :]
    g2 = aux2_ref[1:2, :]
    be2 = aux2_ref[2:3, :]
    h = jnp.dot(h.astype(jnp.bfloat16), w2_ref[...],
                preferred_element_type=jnp.float32) + b2
    h = _layernorm(h, g2, be2)
    h = jnp.maximum(h, 0.0)

    # --- Block 3: Linear(256 -> 384) bf16 MXU matmul + LN ---
    b3 = aux3_ref[0:1, :]
    g3 = aux3_ref[1:2, :]
    be3 = aux3_ref[2:3, :]
    h = jnp.dot(h.astype(jnp.bfloat16), w3_ref[...],
                preferred_element_type=jnp.float32) + b3
    h = _layernorm(h, g3, be3)

    # Single cast at the final store (bf16 default halves HBM store traffic).
    o_ref[...] = h.astype(o_ref.dtype)


def clinical_prior_encoder(prior, params, *, block_b=1024, out_dtype=jnp.bfloat16):
    """prior: [B, PRIOR_DIM] float32 -> [B, OUTPUT_DIM] out_dtype."""
    B = prior.shape[0]

    # Batch tile: multiple of 16 (bf16 sublane packing), capped so that
    # whenever B > 16 there are at least 2 grid steps (v7x megacore split).
    TB = max(16, min(_round_up(block_b, 16), _round_up(pl.cdiv(B, 2), 16)))
    grid_b = pl.cdiv(B, TB)
    B_pad = grid_b * TB

    # Host-side pad: rows to B_pad (unmasked stores), columns 3 -> 8 (MXU K dim).
    prior = jnp.pad(prior, ((0, B_pad - B), (0, PRIOR_DIM_PAD - PRIOR_DIM)))

    const_map = lambda i: (0, 0)

    out = pl.pallas_call(
        clinical_prior_encoder_kernel,
        out_shape=jax.ShapeDtypeStruct((B_pad, OUTPUT_DIM), out_dtype),
        grid=(grid_b,),
        in_specs=[
            pl.BlockSpec((TB, PRIOR_DIM_PAD), lambda i: (i, 0)),        # prior tile
            pl.BlockSpec((PRIOR_DIM_PAD, HIDDEN_DIM), const_map),       # w1 (VMEM-resident)
            pl.BlockSpec((3, HIDDEN_DIM), const_map),                   # b1/g1/be1
            pl.BlockSpec((HIDDEN_DIM, 2 * HIDDEN_DIM), const_map),      # w2 (resident)
            pl.BlockSpec((3, 2 * HIDDEN_DIM), const_map),               # b2/g2/be2
            pl.BlockSpec((2 * HIDDEN_DIM, OUTPUT_DIM), const_map),      # w3 (resident)
            pl.BlockSpec((3, OUTPUT_DIM), const_map),                   # b3/g3/be3
        ],
        # TODO(synk): if xprof on v5e shows exposed writeback DMA at large TB,
        # add pipeline_mode=pl.Buffered(3) to this out_spec.
        out_specs=pl.BlockSpec((TB, OUTPUT_DIM), lambda i: (i, 0)),
        compiler_params=pltpu.CompilerParams(
            dimension_semantics=("parallel",),   # megacore sharding on v7x
            # Footprint at TB=1024 (double-buffered I/O + f32 activations +
            # resident weights) is < 8 MiB; 32 MiB is safe on every generation
            # including v7x's 64 MiB physical VMEM.
            vmem_limit_bytes=32 * 1024 * 1024,
        ),
    )(
        prior,
        params["w1"], params["aux1"],
        params["w2"], params["aux2"],
        params["w3"], params["aux3"],
    )
    if B_pad != B:
        out = out[:B]
    return out


def _xavier_uniform(key, fan_in, fan_out, dtype=jnp.float32):
    # Matches torch.nn.init.xavier_uniform_ (gain=1).
    limit = math.sqrt(6.0 / (fan_in + fan_out))
    w = jax.random.uniform(key, (fan_in, fan_out), dtype=jnp.float32,
                           minval=-limit, maxval=limit)
    # Weights stored pre-transposed ([fan_in, fan_out]) vs PyTorch's [out, in].
    return w.astype(dtype)


def _aux_pack(d):
    # Rows: [linear bias, LN gamma, LN beta]  (PyTorch init: 0, 1, 0).
    return jnp.stack(
        [jnp.zeros((d,), jnp.float32),
         jnp.ones((d,), jnp.float32),
         jnp.zeros((d,), jnp.float32)],
        axis=0,
    )


def init_params(key):
    k1, k2, k3 = jax.random.split(key, 3)
    w1 = _xavier_uniform(k1, PRIOR_DIM, HIDDEN_DIM, jnp.float32)
    # Zero-pad w1 rows 3..7 so the padded prior columns contribute nothing.
    w1 = jnp.pad(w1, ((0, PRIOR_DIM_PAD - PRIOR_DIM), (0, 0)))
    return {
        "w1": w1,                                                   # [8, 128] f32
        "aux1": _aux_pack(HIDDEN_DIM),
        "w2": _xavier_uniform(k2, HIDDEN_DIM, 2 * HIDDEN_DIM, jnp.bfloat16),
        "aux2": _aux_pack(2 * HIDDEN_DIM),
        "w3": _xavier_uniform(k3, 2 * HIDDEN_DIM, OUTPUT_DIM, jnp.bfloat16),
        "aux3": _aux_pack(OUTPUT_DIM),
    }


def reference_forward(prior, p):
    """Pure-JAX reference mirroring the PyTorch forward (eval mode),
    with the same bf16 matmul precision as the kernel for layers 2/3.
    (bf16 weights / bf16 output deviate from the f32 PyTorch module at ~1e-2
    relative error — intentional inference-precision choice.)"""
    def ln(h, g, b):
        mean = jnp.mean(h, axis=-1, keepdims=True)
        var = jnp.mean(jnp.square(h - mean), axis=-1, keepdims=True)
        return (h - mean) * jax.lax.rsqrt(var + LN_EPS) * g + b

    b1, g1, be1 = p["aux1"][0], p["aux1"][1], p["aux1"][2]
    b2, g2, be2 = p["aux2"][0], p["aux2"][1], p["aux2"][2]
    b3, g3, be3 = p["aux3"][0], p["aux3"][1], p["aux3"][2]

    h = prior @ p["w1"][:PRIOR_DIM] + b1
    h = jnp.maximum(ln(h, g1, be1), 0.0)
    h = jnp.dot(h.astype(jnp.bfloat16), p["w2"],
                preferred_element_type=jnp.float32) + b2
    h = jnp.maximum(ln(h, g2, be2), 0.0)
    h = jnp.dot(h.astype(jnp.bfloat16), p["w3"],
                preferred_element_type=jnp.float32) + b3
    return ln(h, g3, be3)


if __name__ == "__main__":
    key = jax.random.PRNGKey(0)
    k_param, k_input = jax.random.split(key)

    B = 8
    prior = jax.random.normal(k_input, (B, PRIOR_DIM), dtype=jnp.float32)
    params = init_params(k_param)

    out = clinical_prior_encoder(prior, params)          # bf16 output by default
    out = jax.block_until_ready(out)

    ref = reference_forward(prior, params)
    assert out.shape == (B, OUTPUT_DIM), out.shape
    assert jnp.allclose(out.astype(jnp.float32), ref, atol=3e-2, rtol=3e-2), \
        "mismatch vs reference"

    print("KERNEL_OK")
</pallas_src>

<mosaic_0001>
module attributes {stable_mosaic.version = 11 : i64} {
  func.func @clinical_prior_encoder_kernel(%arg0: i32, %arg1: memref<16x8xf32, #tpu.memory_space<vmem>>, %arg2: memref<8x128xf32, #tpu.memory_space<vmem>>, %arg3: memref<3x128xf32, #tpu.memory_space<vmem>>, %arg4: memref<128x256xbf16, #tpu.memory_space<vmem>>, %arg5: memref<3x256xf32, #tpu.memory_space<vmem>>, %arg6: memref<256x384xbf16, #tpu.memory_space<vmem>>, %arg7: memref<3x384xf32, #tpu.memory_space<vmem>>, %arg8: memref<16x384xbf16, #tpu.memory_space<vmem>>) attributes {dimension_semantics = [#tpu.dimension_semantics<parallel>], iteration_bounds = array<i64: 1>, scalar_prefetch = 0 : i64, scratch_operands = 0 : i64, tpu.core_type = #tpu.core_type<tc>, window_params = [{transform_indices = @transform_0, window_bounds = array<i64: 16, 8>}, {pipeline_mode = #tpu.pipeline_mode<synchronous>, transform_indices = @transform_1, window_bounds = array<i64: 8, 128>}, {pipeline_mode = #tpu.pipeline_mode<synchronous>, transform_indices = @transform_2, window_bounds = array<i64: 3, 128>}, {pipeline_mode = #tpu.pipeline_mode<synchronous>, transform_indices = @transform_3, window_bounds = array<i64: 128, 256>}, {pipeline_mode = #tpu.pipeline_mode<synchronous>, transform_indices = @transform_4, window_bounds = array<i64: 3, 256>}, {pipeline_mode = #tpu.pipeline_mode<synchronous>, transform_indices = @transform_5, window_bounds = array<i64: 256, 384>}, {pipeline_mode = #tpu.pipeline_mode<synchronous>, transform_indices = @transform_6, window_bounds = array<i64: 3, 384>}, {transform_indices = @transform_7, window_bounds = array<i64: 16, 384>}]} {
    %c0 = arith.constant 0 : index
    %c0_0 = arith.constant 0 : index
    %0 = vector.load %arg1[%c0, %c0_0] : memref<16x8xf32, #tpu.memory_space<vmem>>, vector<16x8xf32>
    %c0_1 = arith.constant 0 : index
    %c0_2 = arith.constant 0 : index
    %1 = vector.load %arg3[%c0_1, %c0_2] : memref<3x128xf32, #tpu.memory_space<vmem>>, vector<1x128xf32>
    %c1 = arith.constant 1 : index
    %c0_3 = arith.constant 0 : index
    %2 = vector.load %arg3[%c1, %c0_3] : memref<3x128xf32, #tpu.memory_space<vmem>>, vector<1x128xf32>
    %c2 = arith.constant 2 : index
    %c0_4 = arith.constant 0 : index
    %3 = vector.load %arg3[%c2, %c0_4] : memref<3x128xf32, #tpu.memory_space<vmem>>, vector<1x128xf32>
    %c0_5 = arith.constant 0 : index
    %c0_6 = arith.constant 0 : index
    %4 = vector.load %arg2[%c0_5, %c0_6] : memref<8x128xf32, #tpu.memory_space<vmem>>, vector<8x128xf32>
    %cst = arith.constant dense<0.000000e+00> : vector<16x128xf32>
    %5 = tpu.matmul %0, %4, %cst {dimension_numbers = #tpu.dot_dimension_numbers<[1], [0], [0], [1], [0, 0, 1, 1], [], []>} : vector<16x8xf32>, vector<8x128xf32>, vector<16x128xf32> -> vector<16x128xf32>
    %6 = vector.broadcast %1 : vector<1x128xf32> to vector<16x128xf32>
    %7 = arith.addf %5, %6 : vector<16x128xf32>
    %cst_7 = arith.constant dense<0.000000e+00> : vector<16xf32>
    %8 = vector.multi_reduction <add>, %7, %cst_7 [1] : vector<16x128xf32> to vector<16xf32>
    %9 = vector.shape_cast %8 : vector<16xf32> to vector<16x1xf32>
    %cst_8 = arith.constant 1.280000e+02 : f32
    %10 = vector.broadcast %cst_8 : f32 to vector<16x1xf32>
    %11 = arith.divf %9, %10 : vector<16x1xf32>
    %12 = vector.broadcast %11 : vector<16x1xf32> to vector<16x128xf32>
    %13 = arith.subf %7, %12 : vector<16x128xf32>
    %14 = arith.mulf %13, %13 : vector<16x128xf32>
    %cst_9 = arith.constant dense<0.000000e+00> : vector<16xf32>
    %15 = vector.multi_reduction <add>, %14, %cst_9 [1] : vector<16x128xf32> to vector<16xf32>
    %16 = vector.shape_cast %15 : vector<16xf32> to vector<16x1xf32>
    %cst_10 = arith.constant 1.280000e+02 : f32
    %17 = vector.broadcast %cst_10 : f32 to vector<16x1xf32>
    %18 = arith.divf %16, %17 : vector<16x1xf32>
    %cst_11 = arith.constant 9.99999974E-6 : f32
    %19 = vector.broadcast %cst_11 : f32 to vector<16x1xf32>
    %20 = arith.addf %18, %19 : vector<16x1xf32>
    %21 = math.rsqrt %20 : vector<16x1xf32>
    %22 = vector.broadcast %21 : vector<16x1xf32> to vector<16x128xf32>
    %23 = arith.mulf %13, %22 : vector<16x128xf32>
    %24 = vector.broadcast %2 : vector<1x128xf32> to vector<16x128xf32>
    %25 = arith.mulf %23, %24 : vector<16x128xf32>
    %26 = vector.broadcast %3 : vector<1x128xf32> to vector<16x128xf32>
    %27 = arith.addf %25, %26 : vector<16x128xf32>
    %cst_12 = arith.constant 0.000000e+00 : f32
    %28 = vector.broadcast %cst_12 : f32 to vector<16x128xf32>
    %29 = arith.maximumf %27, %28 : vector<16x128xf32>
    %c0_13 = arith.constant 0 : index
    %c0_14 = arith.constant 0 : index
    %30 = vector.load %arg5[%c0_13, %c0_14] : memref<3x256xf32, #tpu.memory_space<vmem>>, vector<1x256xf32>
    %c1_15 = arith.constant 1 : index
    %c0_16 = arith.constant 0 : index
    %31 = vector.load %arg5[%c1_15, %c0_16] : memref<3x256xf32, #tpu.memory_space<vmem>>, vector<1x256xf32>
    %c2_17 = arith.constant 2 : index
    %c0_18 = arith.constant 0 : index
    %32 = vector.load %arg5[%c2_17, %c0_18] : memref<3x256xf32, #tpu.memory_space<vmem>>, vector<1x256xf32>
    %33 = arith.truncf %29 : vector<16x128xf32> to vector<16x128xbf16>
    %c0_19 = arith.constant 0 : index
    %c0_20 = arith.constant 0 : index
    %34 = vector.load %arg4[%c0_19, %c0_20] : memref<128x256xbf16, #tpu.memory_space<vmem>>, vector<128x256xbf16>
    %cst_21 = arith.constant dense<0.000000e+00> : vector<16x256xf32>
    %35 = tpu.matmul %33, %34, %cst_21 {dimension_numbers = #tpu.dot_dimension_numbers<[1], [0], [0], [1], [0, 0, 1, 1], [], []>} : vector<16x128xbf16>, vector<128x256xbf16>, vector<16x256xf32> -> vector<16x256xf32>
    %36 = vector.broadcast %30 : vector<1x256xf32> to vector<16x256xf32>
    %37 = arith.addf %35, %36 : vector<16x256xf32>
    %cst_22 = arith.constant dense<0.000000e+00> : vector<16xf32>
    %38 = vector.multi_reduction <add>, %37, %cst_22 [1] : vector<16x256xf32> to vector<16xf32>
    %39 = vector.shape_cast %38 : vector<16xf32> to vector<16x1xf32>
    %cst_23 = arith.constant 2.560000e+02 : f32
    %40 = vector.broadcast %cst_23 : f32 to vector<16x1xf32>
    %41 = arith.divf %39, %40 : vector<16x1xf32>
    %42 = vector.broadcast %41 : vector<16x1xf32> to vector<16x256xf32>
    %43 = arith.subf %37, %42 : vector<16x256xf32>
    %44 = arith.mulf %43, %43 : vector<16x256xf32>
    %cst_24 = arith.constant dense<0.000000e+00> : vector<16xf32>
    %45 = vector.multi_reduction <add>, %44, %cst_24 [1] : vector<16x256xf32> to vector<16xf32>
    %46 = vector.shape_cast %45 : vector<16xf32> to vector<16x1xf32>
    %cst_25 = arith.constant 2.560000e+02 : f32
    %47 = vector.broadcast %cst_25 : f32 to vector<16x1xf32>
    %48 = arith.divf %46, %47 : vector<16x1xf32>
    %cst_26 = arith.constant 9.99999974E-6 : f32
    %49 = vector.broadcast %cst_26 : f32 to vector<16x1xf32>
    %50 = arith.addf %48, %49 : vector<16x1xf32>
    %51 = math.rsqrt %50 : vector<16x1xf32>
    %52 = vector.broadcast %51 : vector<16x1xf32> to vector<16x256xf32>
    %53 = arith.mulf %43, %52 : vector<16x256xf32>
    %54 = vector.broadcast %31 : vector<1x256xf32> to vector<16x256xf32>
    %55 = arith.mulf %53, %54 : vector<16x256xf32>
    %56 = vector.broadcast %32 : vector<1x256xf32> to vector<16x256xf32>
    %57 = arith.addf %55, %56 : vector<16x256xf32>
    %cst_27 = arith.constant 0.000000e+00 : f32
    %58 = vector.broadcast %cst_27 : f32 to vector<16x256xf32>
    %59 = arith.maximumf %57, %58 : vector<16x256xf32>
    %c0_28 = arith.constant 0 : index
    %c0_29 = arith.constant 0 : index
    %60 = vector.load %arg7[%c0_28, %c0_29] : memref<3x384xf32, #tpu.memory_space<vmem>>, vector<1x384xf32>
    %c1_30 = arith.constant 1 : index
    %c0_31 = arith.constant 0 : index
    %61 = vector.load %arg7[%c1_30, %c0_31] : memref<3x384xf32, #tpu.memory_space<vmem>>, vector<1x384xf32>
    %c2_32 = arith.constant 2 : index
    %c0_33 = arith.constant 0 : index
    %62 = vector.load %arg7[%c2_32, %c0_33] : memref<3x384xf32, #tpu.memory_space<vmem>>, vector<1x384xf32>
    %63 = arith.truncf %59 : vector<16x256xf32> to vector<16x256xbf16>
    %c0_34 = arith.constant 0 : index
    %c0_35 = arith.constant 0 : index
    %64 = vector.load %arg6[%c0_34, %c0_35] : memref<256x384xbf16, #tpu.memory_space<vmem>>, vector<256x384xbf16>
    %cst_36 = arith.constant dense<0.000000e+00> : vector<16x384xf32>
    %65 = tpu.matmul %63, %64, %cst_36 {dimension_numbers = #tpu.dot_dimension_numbers<[1], [0], [0], [1], [0, 0, 1, 1], [], []>} : vector<16x256xbf16>, vector<256x384xbf16>, vector<16x384xf32> -> vector<16x384xf32>
    %66 = vector.broadcast %60 : vector<1x384xf32> to vector<16x384xf32>
    %67 = arith.addf %65, %66 : vector<16x384xf32>
    %cst_37 = arith.constant dense<0.000000e+00> : vector<16xf32>
    %68 = vector.multi_reduction <add>, %67, %cst_37 [1] : vector<16x384xf32> to vector<16xf32>
    %69 = vector.shape_cast %68 : vector<16xf32> to vector<16x1xf32>
    %cst_38 = arith.constant 3.840000e+02 : f32
    %70 = vector.broadcast %cst_38 : f32 to vector<16x1xf32>
    %71 = arith.divf %69, %70 : vector<16x1xf32>
    %72 = vector.broadcast %71 : vector<16x1xf32> to vector<16x384xf32>
    %73 = arith.subf %67, %72 : vector<16x384xf32>
    %74 = arith.mulf %73, %73 : vector<16x384xf32>
    %cst_39 = arith.constant dense<0.000000e+00> : vector<16xf32>
    %75 = vector.multi_reduction <add>, %74, %cst_39 [1] : vector<16x384xf32> to vector<16xf32>
    %76 = vector.shape_cast %75 : vector<16xf32> to vector<16x1xf32>
    %cst_40 = arith.constant 3.840000e+02 : f32
    %77 = vector.broadcast %cst_40 : f32 to vector<16x1xf32>
    %78 = arith.divf %76, %77 : vector<16x1xf32>
    %cst_41 = arith.constant 9.99999974E-6 : f32
    %79 = vector.broadcast %cst_41 : f32 to vector<16x1xf32>
    %80 = arith.addf %78, %79 : vector<16x1xf32>
    %81 = math.rsqrt %80 : vector<16x1xf32>
    %82 = vector.broadcast %81 : vector<16x1xf32> to vector<16x384xf32>
    %83 = arith.mulf %73, %82 : vector<16x384xf32>
    %84 = vector.broadcast %61 : vector<1x384xf32> to vector<16x384xf32>
    %85 = arith.mulf %83, %84 : vector<16x384xf32>
    %86 = vector.broadcast %62 : vector<1x384xf32> to vector<16x384xf32>
    %87 = arith.addf %85, %86 : vector<16x384xf32>
    %88 = arith.truncf %87 : vector<16x384xf32> to vector<16x384xbf16>
    %c0_42 = arith.constant 0 : index
    %c0_43 = arith.constant 0 : index
    %89 = vector.load %arg8[%c0_42, %c0_43] : memref<16x384xbf16, #tpu.memory_space<vmem>>, vector<16x384xbf16>
    tpu.vector_store %arg8[%c0_42, %c0_43], %88 {strides = array<i32>} : memref<16x384xbf16, #tpu.memory_space<vmem>>, vector<16x384xbf16>,
    return
  }
  func.func @transform_0(%arg0: i32) -> (i32, i32) {
    %c0_i32 = arith.constant 0 : i32
    %c0_i32_0 = arith.constant 0 : i32
    return %arg0, %c0_i32 : i32, i32
  }
  func.func @transform_1(%arg0: i32) -> (i32, i32) {
    %c0_i32 = arith.constant 0 : i32
    %c0_i32_0 = arith.constant 0 : i32
    %c0_i32_1 = arith.constant 0 : i32
    return %c0_i32, %c0_i32_0 : i32, i32
  }
  func.func @transform_2(%arg0: i32) -> (i32, i32) {
    %c0_i32 = arith.constant 0 : i32
    %c0_i32_0 = arith.constant 0 : i32
    %c0_i32_1 = arith.constant 0 : i32
    return %c0_i32, %c0_i32_0 : i32, i32
  }
  func.func @transform_3(%arg0: i32) -> (i32, i32) {
    %c0_i32 = arith.constant 0 : i32
    %c0_i32_0 = arith.constant 0 : i32
    %c0_i32_1 = arith.constant 0 : i32
    return %c0_i32, %c0_i32_0 : i32, i32
  }
  func.func @transform_4(%arg0: i32) -> (i32, i32) {
    %c0_i32 = arith.constant 0 : i32
    %c0_i32_0 = arith.constant 0 : i32
    %c0_i32_1 = arith.constant 0 : i32
    return %c0_i32, %c0_i32_0 : i32, i32
  }
  func.func @transform_5(%arg0: i32) -> (i32, i32) {
    %c0_i32 = arith.constant 0 : i32
    %c0_i32_0 = arith.constant 0 : i32
    %c0_i32_1 = arith.constant 0 : i32
    return %c0_i32, %c0_i32_0 : i32, i32
  }
  func.func @transform_6(%arg0: i32) -> (i32, i32) {
    %c0_i32 = arith.constant 0 : i32
    %c0_i32_0 = arith.constant 0 : i32
    %c0_i32_1 = arith.constant 0 : i32
    return %c0_i32, %c0_i32_0 : i32, i32
  }
  func.func @transform_7(%arg0: i32) -> (i32, i32) {
    %c0_i32 = arith.constant 0 : i32
    %c0_i32_0 = arith.constant 0 : i32
    return %arg0, %c0_i32 : i32, i32
  }
}

</mosaic_0001>

<bundles_post_ra>
// kernel: tpu_custom_call.1
= control target key start
LH: loop header
LB: loop body
LE: loop exit
PB: predicated region body
PF: predicated region fallthrough
CT: control target
= control target key end

     0   :  { %12 = vsyncpa [#allocation3], 0  ;;  %s1421_s0 = inlined_call_operand.vmem [shape: f32[16,8], index: 0, kind: input, shape index: {}]   ;;  %s1422_s1 = inlined_call_operand.vmem [shape: f32[8,128], index: 1, kind: input, shape index: {}]   ;;  %s1423_s2 = inlined_call_operand.hbm [shape: f32[3,128], index: 2, kind: input, shape index: {}]   ;;  %s1424_s3 = inlined_call_operand.hbm [shape: bf16[128,256], index: 3, kind: input, shape index: {}]   ;;  %s1425_s4 = inlined_call_operand.vmem [shape: f32[3,256], index: 4, kind: input, shape index: {}]   ;;  %s1426_s5 = inlined_call_operand.hbm [shape: bf16[256,384], index: 5, kind: input, shape index: {}]   ;;  %s1427_s6 = inlined_call_operand.vmem [shape: f32[3,384], index: 6, kind: input, shape index: {}]   ;;  %s1428_s7 = inlined_call_operand.hbm [shape: bf16[16,384], index: 7, kind: output, shape index: {}]  }
   0x1   :  { %13 = vsyncpa [#allocation6], 0 }
   0x2   :  { %14 = vsyncpa [#allocation4], 0  ;;  %s1281_s24 = smov [#allocation5]  }
   0x3   :  { %s34_s25 = sshll.u32 %s1281_s24, 4  ;;  %s35_s25 = int_to_ptr.vmem [resolvable:$true] %s34_s25 }
   0x4   :  { %s1203_s26 = scalar_lea.vmem %s35_s25, 2048  ;;  %p1208_p1 = scmp.lt.s32.totalorder %s35_s25, %s35_s25 }
   0x5   :  { %p1204_p0 = scmp.ne.s32.totalorder %s35_s25, %s1203_s26  ;;  %p1209_p2 = scmp.lt.s32.totalorder %s1203_s26, %s1203_s26 }
   0x7   :  { %p1210_p3 = por %p1209_p2, %p1208_p1 }
   0x9   :  { %p1211_p4 = pnand %p1210_p3, %p1204_p0 }
   0xb   :  { %1214 = shalt.err (!%p1211_p4)
}
   0xc   :  { %s1282_s27 = smov 128   ;;  %s1283_s28 = smov 8  }
   0xd   :  { %40 = dma.hbm_to_vmem [thread:$0]  %s1424_s3, 2048, %s35_s25, [#allocation6], %s1282_s27, %s1282_s27, %s1283_s28  }
   0xe   :  { %s1284_s8 = smov [#allocation2]   ;;  %s1285_s10 = smov [#allocation7]  }
   0xf   :  { %s25_s9 = sshll.u32 %s1284_s8, 4  ;;  %s48_s11 = sshll.u32 %s1285_s10, 4  ;;  %s26_s9 = int_to_ptr.vmem [resolvable:$true] %s25_s9  ;;  %s49_s11 = int_to_ptr.vmem [resolvable:$true] %s48_s11 }
  0x10   :  { %s1223_s12 = scalar_lea.vmem %s26_s9, 64  ;;  %p1228_p6 = scmp.lt.s32.totalorder %s26_s9, %s26_s9 }
  0x11   :  { %p1224_p5 = scmp.ne.s32.totalorder %s26_s9, %s1223_s12  ;;  %p1229_p7 = scmp.lt.s32.totalorder %s1223_s12, %s1223_s12 }
  0x13   :  { %p1230_p8 = por %p1229_p7, %p1228_p6 }
  0x15   :  { %p1231_p9 = pnand %p1230_p8, %p1224_p5 }
  0x17   :  { %1234 = shalt.err (!%p1231_p9)
}
  0x18   :  { %28 = dma.hbm_to_vmem [thread:$0]  %s1423_s2, 64, %s26_s9, [#allocation3]  }
  0x19   :  { %s1243_s15 = scalar_lea.vmem %s49_s11, 6144  ;;  %p1248_p11 = scmp.lt.s32.totalorder %s49_s11, %s49_s11 }
  0x1a   :  { %p1244_p10 = scmp.ne.s32.totalorder %s49_s11, %s1243_s15  ;;  %p1249_p12 = scmp.lt.s32.totalorder %s1243_s15, %s1243_s15 }
  0x1c   :  { %p1250_p13 = por %p1249_p12, %p1248_p11 }
  0x1e   :  { %p1251_p0 = pnand %p1250_p13, %p1244_p10 }
  0x20   :  { %1254 = shalt.err (!%p1251_p0)
}
  0x21   :  { %s1286_s3 = smov 192   ;;  %s1287_s16 = smov 12  }
  0x22   :  { %54 = dma.hbm_to_vmem [thread:$0]  %s1426_s5, 6144, %s49_s11, [#allocation6], %s1286_s3, %s1286_s3, %s1287_s16  }
  0x23   :  { %1275 = dma.done.wait [#allocation3], 64  }
  0x24   :  { %1276 = vsyncadd [#allocation3], 4294967232 }
  0x25   :  { %1277 = dma.done.wait [#allocation6], 8192  }
  0x26   :  { %1278 = vsyncadd [#allocation6], 4294959104  ;;  %vm77_vm0 = vcmask 64512   ;;  %v72_v0 = vld [vmem:[%s1422_s1] sm:$0xff]  ;;  %v68_v2 = vld [vmem:[%s1421_s0 + $0x8] sm:$0xff]  ;;  %v1288_v25 = vmov 0   ;;  %v219_v52 = vlaneseq }
  0x27   :  { %v67_v1 = vld [vmem:[%s1421_s0] sm:$0xff]  ;;  %1081 = vmatprep.subr.mxu0 %v72_v0  ;;  %v1097_v17 = vld [vmem:[#allocation5 + $0x70] ss:$8 sps:$4 sm:$0xff]   ;;  %v1098_v18 = vld [vmem:[#allocation5 + $0x64] ss:$8 sps:$4 sm:$0xff]   ;;  %341 = vmatprep.mubr.bf16.mxu1 %v1288_v25 }
  0x28   :  { %1083 = vmatprep.mubr.msk.f32.mxu0 %vm77_vm0, %v67_v1  ;;  %1082 = vmatpush3.msra.mxu0 %v72_v0  ;;  %v975_v4 = vld [vmem:[#allocation2] ss:$0 sm:$0xff]  ;;  %v1100_v19 = vld [vmem:[#allocation5 + $0x60] ss:$8 sps:$4 sm:$0xff]   ;;  %v1103_v21 = vld [vmem:[#allocation5 + $0x50] ss:$8 sps:$4 sm:$0xff]  }
  0x29   :  { %1084 = vmatmul.mubr.msk.f32.vlgmr.msra.gmra.mxu0 %vm77_vm0, %v68_v2  ;;  %v1095_v16 = vld [vmem:[#allocation5 + $0x74] ss:$8 sps:$4 sm:$0xff]   ;;  %v1104_v22 = vld [vmem:[#allocation5 + $0x44] ss:$8 sps:$4 sm:$0xff]   ;;  %v1106_v23 = vld [vmem:[#allocation5 + $0x40] ss:$8 sps:$4 sm:$0xff]  }
  0x2a   :  { %309 = vmatprep.subr.bf16.mxu1 %v1095_v16  ;;  %v1101_v20 = vld [vmem:[#allocation5 + $0x54] ss:$8 sps:$4 sm:$0xff]   ;;  %v1109_v26 = vld [vmem:[#allocation5 + $0x30] ss:$8 sps:$4 sm:$0xff]   ;;  %v1110_v27 = vld [vmem:[#allocation5 + $0x24] ss:$8 sps:$4 sm:$0xff]  }
  0x2b   :  { %310 = vmatpush1.bf16.msra.mxu1 %v1097_v17  ;;  %v1107_v24 = vld [vmem:[#allocation5 + $0x34] ss:$8 sps:$4 sm:$0xff]   ;;  %v1112_v28 = vld [vmem:[#allocation5 + $0x20] ss:$8 sps:$4 sm:$0xff]   ;;  %v1115_v30 = vld [vmem:[#allocation5 + $0x10] ss:$8 sps:$4 sm:$0xff]  }
  0x2c   :  { %311 = vmatprep.subr.bf16.mxu1 %v1098_v18  ;;  %v1113_v29 = vld [vmem:[#allocation5 + $0x14] ss:$8 sps:$4 sm:$0xff]   ;;  %v1116_v31 = vld [vmem:[#allocation5 + $0x4] ss:$8 sps:$4 sm:$0xff]   ;;  %v1118_v32 = vld [vmem:[#allocation5] ss:$8 sps:$4 sm:$0xff]  }
  0x2d   :  { %v978_v40 = vld [vmem:[#allocation2 + $0x1] ss:$0 sm:$0xff]  ;;  %v979_v44 = vld [vmem:[#allocation2 + $0x2] ss:$0 sm:$0xff]  ;;  %v1351_v53 = vshrl.u32 %v219_v52, 7 }
  0x2e   :  { %v196_v56 = vld [vmem:[%s1425_s4] ss:$4 sm:$0x3]  ;;  %v1137_v18 = vld [vmem:[#allocation7 + $0x18] ss:$12 sps:$4 sm:$0xff]  }
  0x2f   :  { %312 = vmatpush1.bf16.msra.mxu1 %v1100_v19  ;;  %v1354_v54 = vsub.s32 0, %v1351_v53  ;;  %v1357_v55 = vsub.s32 1, %v1351_v53  ;;  %v1134_v16 = vld [vmem:[#allocation7 + $0x30] ss:$12 sps:$4 sm:$0xff]  }
  0x30   :  { %313 = vmatprep.subr.bf16.mxu1 %v1101_v20  ;;  %v1139_v17 = vld [vmem:[#allocation7 + $0x1c] ss:$12 sps:$4 sm:$0xff]   ;;  %v1142_v19 = vld [vmem:[#allocation7 + $0x4] ss:$12 sps:$4 sm:$0xff]   ;;  %v1140_v20 = vld [vmem:[#allocation7] ss:$12 sps:$4 sm:$0xff]  }
  0x31   :  { %v222_v57 = vrot.slane %v196_v56, %v1354_v54  ;;  %v226_v58 = vrot.slane %v196_v56, %v1357_v55  ;;  %v1166_v52 = vld [vmem:[#allocation7 + $0x110] ss:$12 sps:$4 sm:$0xff]   ;;  %v1163_v56 = vld [vmem:[#allocation7 + $0x108] ss:$12 sps:$4 sm:$0xff]  }
  0x33   :  { %314 = vmatpush1.bf16.msra.mxu1 %v1103_v21 }
  0x34   :  { %315 = vmatprep.subr.bf16.mxu1 %v1104_v22 }
  0x37   :  { %316 = vmatpush1.bf16.msra.mxu1 %v1106_v23 }
  0x38   :  { %317 = vmatprep.subr.bf16.mxu1 %v1107_v24 }
  0x3b   :  { %318 = vmatpush1.bf16.msra.mxu1 %v1109_v26 }
  0x3c   :  { %319 = vmatprep.subr.bf16.mxu1 %v1110_v27 }
  0x3f   :  { %320 = vmatpush1.bf16.msra.mxu1 %v1112_v28 }
  0x40   :  { %321 = vmatprep.subr.bf16.mxu1 %v1113_v29 }
  0x43   :  { %322 = vmatpush1.bf16.msra.mxu1 %v1115_v30 }
  0x44   :  { %323 = vmatprep.subr.bf16.mxu1 %v1116_v31 }
  0x47   :  { %324 = vmatpush1.bf16.msra.mxu1 %v1118_v32 }
  0xe9   :  { %v1085_v3 = vpop.f32.mrf.mxu0 }
  0xea   :  { %v156_v7 = vadd.f32 %v1085_v3, %v975_v4 }
  0xeb   :  { %v150_v5 = vpop.f32.mrf.mxu0 }
  0xec   :  { %v151_v6 = vadd.f32 %v975_v4, %v150_v5  ;;  %v1119_v5 = vld [vmem:[#allocation7 + $0xa8] ss:$12 sps:$4 sm:$0xff]  }
  0xee   :  { %159 = vadd.xlane.f32.xlu0 %v151_v6 }
  0xf2   :  { %161 = vadd.xlane.f32.xlu0 %v156_v7 }
 0x177   :  { %v160_v8 = vpop.xlane.xlu0 %159 }
 0x178   :  { %v164_v9 = vmul.f32 0.0078125, %v160_v8  ;;  %v1122_v8 = vld [vmem:[#allocation7 + $0x90] ss:$12 sps:$4 sm:$0xff]  }
 0x17a   :  { %v166_v10 = vsub.f32 %v151_v6, %v164_v9  ;;  %v1121_v6 = vld [vmem:[#allocation7 + $0xac] ss:$12 sps:$4 sm:$0xff]   ;;  %v1127_v9 = vld [vmem:[#allocation7 + $0x7c] ss:$12 sps:$4 sm:$0xff]  }
 0x17b   :  { %v162_v11 = vpop.xlane.xlu0 %161  ;;  %762 = vmatprep.subr.bf16.mxu0 %v1121_v6 }
 0x17c   :  { %v165_v12 = vmul.f32 0.0078125, %v162_v11  ;;  %v168_v13 = vmul.f32 %v166_v10, %v166_v10  ;;  %763 = vmatpush1.bf16.msra.mxu0 %v1119_v5  ;;  %v1130_v11 = vld [vmem:[#allocation7 + $0x64] ss:$12 sps:$4 sm:$0xff]   ;;  %v1182_v5 = vld [vmem:[#allocation7 + $0x8] ss:$12 sps:$4 sm:$0xff]  }
 0x17e   :  { %v167_v14 = vsub.f32 %v156_v7, %v165_v12  ;;  %170 = vadd.xlane.f32.xlu1 %v168_v13  ;;  %v1124_v7 = vld [vmem:[#allocation7 + $0x94] ss:$12 sps:$4 sm:$0xff]   ;;  %v1133_v13 = vld [vmem:[#allocation7 + $0x4c] ss:$12 sps:$4 sm:$0xff]  }
 0x17f   :  { %764 = vmatprep.subr.bf16.mxu0 %v1124_v7  ;;  %v1128_v12 = vld [vmem:[#allocation7 + $0x60] ss:$12 sps:$4 sm:$0xff]  }
 0x180   :  { %v169_v15 = vmul.f32 %v167_v14, %v167_v14  ;;  %765 = vmatpush1.bf16.msra.mxu0 %v1122_v8 }
 0x181   :  { %766 = vmatprep.subr.bf16.mxu0 %v1127_v9 }
 0x182   :  { %172 = vadd.xlane.f32.xlu1 %v169_v15  ;;  %v1136_v15 = vld [vmem:[#allocation7 + $0x34] ss:$12 sps:$4 sm:$0xff]  }
 0x207   :  { %v171_v33 = vpop.xlane.xlu1 %170 }
 0x208   :  { %v174_v34 = vmul.f32 0.0078125, %v171_v33 }
 0x20a   :  { %v176_v35 = vadd.f32 1e-05, %v174_v34 }
 0x20b   :  { %v173_v36 = vpop.xlane.xlu1 %172 }
 0x20c   :  { %1183 = vrsqrt.f32 %v176_v35  ;;  %v175_v37 = vmul.f32 0.0078125, %v173_v36  ;;  %v1145_v35 = vld [vmem:[#allocation7 + $0x16c] ss:$12 sps:$4 sm:$0xff]   ;;  %v1146_v36 = vld [vmem:[#allocation7 + $0x170] ss:$12 sps:$4 sm:$0xff]  }
 0x20d   :  { %1059 = vmatprep.subr.bf16.mxu1 %v1146_v36 }
 0x20e   :  { %v177_v38 = vadd.f32 1e-05, %v175_v37  ;;  %v1143_v37 = vld [vmem:[#allocation7 + $0x168] ss:$12 sps:$4 sm:$0xff]  }
 0x210   :  { %1185 = vrsqrt.f32 %v177_v38  ;;  %v1147_v38 = vld [vmem:[#allocation7 + $0xb0] ss:$12 sps:$4 sm:$0xff]  }
 0x219   :  { %v1184_v39 = vpop.eup %1183 }
 0x21a   :  { %v180_v41 = vmul.f32 %v1184_v39, %v166_v10  ;;  %v1125_v10 = vld [vmem:[#allocation7 + $0x78] ss:$12 sps:$4 sm:$0xff]   ;;  %v1150_v39 = vld [vmem:[#allocation7 + $0x154] ss:$12 sps:$4 sm:$0xff]  }
 0x21b   :  { %767 = vmatpush1.bf16.msra.mxu0 %v1125_v10 }
 0x21c   :  { %v186_v42 = vmul.f32 %v978_v40, %v180_v41  ;;  %768 = vmatprep.subr.bf16.mxu0 %v1130_v11  ;;  %v1148_v41 = vld [vmem:[#allocation7 + $0x150] ss:$12 sps:$4 sm:$0xff]  }
 0x21d   :  { %v1186_v43 = vpop.eup %1185 }
 0x21e   :  { %v181_v45 = vmul.f32 %v1186_v43, %v167_v14  ;;  %v192_v47 = vadd.f32 %v979_v44, %v186_v42  ;;  %v1131_v14 = vld [vmem:[#allocation7 + $0x48] ss:$12 sps:$4 sm:$0xff]   ;;  %v1152_v42 = vld [vmem:[#allocation7 + $0x98] ss:$12 sps:$4 sm:$0xff]  }
 0x21f   :  { %769 = vmatpush1.bf16.msra.mxu0 %v1128_v12  ;;  %v1155_v43 = vld [vmem:[#allocation7 + $0x13c] ss:$12 sps:$4 sm:$0xff]  }
 0x220   :  { %v187_v46 = vmul.f32 %v978_v40, %v181_v45  ;;  %v194_v49 = vmax.f32 %v192_v47, 0.0  ;;  %770 = vmatprep.subr.bf16.mxu0 %v1133_v13  ;;  %v1151_v40 = vld [vmem:[#allocation7 + $0x158] ss:$12 sps:$4 sm:$0xff]   ;;  %v980_v12 = vld [vmem:[%s1425_s4 + $0x1] ss:$4 sm:$0x3] }
 0x221   :  { %v1153_v45 = vld [vmem:[#allocation7 + $0x138] ss:$12 sps:$4 sm:$0xff]   ;;  %v389_v13 = vrot.slane %v980_v12, %v1354_v54 }
 0x222   :  { %v193_v48 = vadd.f32 %v979_v44, %v187_v46  ;;  %v1156_v44 = vld [vmem:[#allocation7 + $0x140] ss:$12 sps:$4 sm:$0xff]   ;;  %v1160_v47 = vld [vmem:[#allocation7 + $0x124] ss:$12 sps:$4 sm:$0xff]  }
 0x223   :  { %771 = vmatpush1.bf16.msra.mxu0 %v1131_v14  ;;  %v1157_v46 = vld [vmem:[#allocation7 + $0x80] ss:$12 sps:$4 sm:$0xff]   ;;  %v393_v14 = vrot.slane %v980_v12, %v1357_v55 }
 0x224   :  { %v195_v50 = vmax.f32 %v193_v48, 0.0  ;;  %772 = vmatprep.subr.bf16.mxu0 %v1136_v15  ;;  %v1161_v48 = vld [vmem:[#allocation7 + $0x128] ss:$12 sps:$4 sm:$0xff]  }
 0x226   :  { %v201_v51 = vpack.c.bf16 %v195_v50, %v194_v49  ;;  %v1158_v49 = vld [vmem:[#allocation7 + $0x120] ss:$12 sps:$4 sm:$0xff]   ;;  %v1162_v50 = vld [vmem:[#allocation7 + $0x68] ss:$12 sps:$4 sm:$0xff]  }
 0x227   :  { %773 = vmatpush1.bf16.msra.mxu0 %v1134_v16  ;;  %v981_v16 = vld [vmem:[%s1425_s4 + $0x2] ss:$4 sm:$0x3] }
 0x228   :  { %342 = vmatmul.mubr.bf16.vlgmr.msra.gmra.mxu1 %v201_v51  ;;  %774 = vmatprep.subr.bf16.mxu0 %v1139_v17  ;;  %v1165_v51 = vld [vmem:[#allocation7 + $0x10c] ss:$12 sps:$4 sm:$0xff]  }
 0x229   :  { %1060 = vmatpush3.bf16.msra.mxu1 %v1147_v38 }
 0x22a   :  { %1061 = vmatprep.subr.bf16.mxu1 %v1151_v40 }
 0x22b   :  { %775 = vmatpush1.bf16.msra.mxu0 %v1137_v18 }
 0x22c   :  { %776 = vmatprep.subr.bf16.mxu0 %v1142_v19 }
 0x22d   :  { %1062 = vmatpush3.bf16.msra.mxu1 %v1152_v42 }
 0x22e   :  { %1063 = vmatprep.subr.bf16.mxu1 %v1156_v44 }
 0x22f   :  { %777 = vmatpush1.bf16.msra.mxu0 %v1140_v20  ;;  %v404_v20 = vrot.slane %v981_v16, %v1354_v54 }
 0x230   :  { %778 = vmatprep.subr.bf16.mxu0 %v1145_v35 }
 0x231   :  { %1064 = vmatpush3.bf16.msra.mxu1 %v1157_v46 }
 0x232   :  { %1065 = vmatprep.subr.bf16.mxu1 %v1161_v48 }
 0x233   :  { %779 = vmatpush2.bf16.msra.mxu0 %v1143_v37 }
 0x234   :  { %780 = vmatprep.subr.bf16.mxu0 %v1150_v39 }
 0x235   :  { %1066 = vmatpush3.bf16.msra.mxu1 %v1162_v50 }
 0x236   :  { %1067 = vmatprep.subr.bf16.mxu1 %v1166_v52 }
 0x237   :  { %781 = vmatpush2.bf16.msra.mxu0 %v1148_v41 }
 0x238   :  { %782 = vmatprep.subr.bf16.mxu0 %v1155_v43 }
 0x23b   :  { %783 = vmatpush2.bf16.msra.mxu0 %v1153_v45 }
 0x23c   :  { %784 = vmatprep.subr.bf16.mxu0 %v1160_v47 }
 0x23f   :  { %785 = vmatpush2.bf16.msra.mxu0 %v1158_v49 }
 0x240   :  { %786 = vmatprep.subr.bf16.mxu0 %v1165_v51 }
 0x243   :  { %787 = vmatpush2.bf16.msra.mxu0 %v1163_v56 }
 0x2e8   :  { %v343_v59 = vpop.f32.mrf.mxu1 }
 0x2e9   :  { %v344_v61 = vadd.f32 %v343_v59, %v222_v57  ;;  %v1171_v59 = vld [vmem:[#allocation7 + $0xf8] ss:$12 sps:$4 sm:$0xff]  }
 0x2ea   :  { %v345_v60 = vpop.f32.mrf.mxu1 }
 0x2eb   :  { %v346_v62 = vadd.f32 %v345_v60, %v226_v58  ;;  %v1168_v60 = vld [vmem:[#allocation7 + $0xf0] ss:$12 sps:$4 sm:$0xff]  }
 0x2ec   :  { %v347_v63 = vpop.f32.mrf.mxu1 }
 0x2ed   :  { %v352_v0 = vadd.f32 %v346_v62, %v344_v61  ;;  %v348_v2 = vadd.f32 %v347_v63, %v222_v57  ;;  %v1167_v57 = vld [vmem:[#allocation7 + $0x50] ss:$12 sps:$4 sm:$0xff]   ;;  %v1176_v63 = vld [vmem:[#allocation7 + $0xe0] ss:$12 sps:$4 sm:$0xff]  }
 0x2ee   :  { %v349_v1 = vpop.f32.mrf.mxu1  ;;  %1068 = vmatpush3.bf16.msra.mxu1 %v1167_v57 }
 0x2ef   :  { %v350_v3 = vadd.f32 %v349_v1, %v226_v58  ;;  %353 = vadd.xlane.f32.xlu0 %v352_v0  ;;  %v1170_v58 = vld [vmem:[#allocation7 + $0xf4] ss:$12 sps:$4 sm:$0xff]   ;;  %1069 = vmatprep.subr.bf16.mxu1 %v1171_v59  ;;  %v1173_v0 = vld [vmem:[#allocation7 + $0xd8] ss:$12 sps:$4 sm:$0xff]  }
 0x2f0   :  { %788 = vmatprep.subr.bf16.mxu0 %v1170_v58  ;;  %v1177_v1 = vld [vmem:[#allocation7 + $0x20] ss:$12 sps:$4 sm:$0xff]  }
 0x2f1   :  { %v355_v4 = vadd.f32 %v350_v3, %v348_v2  ;;  %789 = vmatpush2.bf16.msra.mxu0 %v1168_v60 }
 0x2f3   :  { %356 = vadd.xlane.f32.xlu1 %v355_v4  ;;  %v1178_v4 = vld [vmem:[#allocation7 + $0xc0] ss:$12 sps:$4 sm:$0xff]  }
 0x378   :  { %v354_v21 = vpop.xlane.xlu0 %353 }
 0x379   :  { %v359_v22 = vmul.f32 0.00390625, %v354_v21  ;;  %v408_v21 = vrot.slane %v981_v16, %v1357_v55 }
 0x37b   :  { %v1364_v23 = vsub.f32 %v344_v61, %v359_v22  ;;  %v1366_v24 = vsub.f32 %v346_v62, %v359_v22  ;;  %v1172_v61 = vld [vmem:[#allocation7 + $0x38] ss:$12 sps:$4 sm:$0xff]   ;;  %v1175_v62 = vld [vmem:[#allocation7 + $0xdc] ss:$12 sps:$4 sm:$0xff]  }
 0x37c   :  { %v357_v25 = vpop.xlane.xlu1 %356  ;;  %1070 = vmatpush3.bf16.msra.mxu1 %v1172_v61  ;;  %790 = vmatprep.subr.bf16.mxu0 %v1175_v62 }
 0x37d   :  { %v360_v26 = vmul.f32 0.00390625, %v357_v25  ;;  %v365_v27 = vmul.f32 %v1364_v23, %v1364_v23  ;;  %v366_v28 = vmul.f32 %v1366_v24, %v1366_v24  ;;  %1071 = vmatprep.subr.bf16.mxu1 %v1176_v63  ;;  %791 = vmatpush2.bf16.msra.mxu0 %v1173_v0 }
 0x37f   :  { %v1372_v29 = vsub.f32 %v348_v2, %v360_v26  ;;  %v1374_v30 = vsub.f32 %v350_v3, %v360_v26  ;;  %v369_v31 = vadd.f32 %v366_v28, %v365_v27  ;;  %v1180_v2 = vld [vmem:[#allocation7 + $0xc4] ss:$12 sps:$4 sm:$0xff]   ;;  %v1181_v3 = vld [vmem:[#allocation7 + $0xc8] ss:$12 sps:$4 sm:$0xff]  }
 0x380   :  { %1072 = vmatpush3.bf16.msra.mxu1 %v1177_v1  ;;  %792 = vmatprep.subr.bf16.mxu0 %v1180_v2 }
 0x381   :  { %370 = vadd.xlane.f32.xlu0 %v369_v31  ;;  %v367_v32 = vmul.f32 %v1372_v29, %v1372_v29  ;;  %v368_v33 = vmul.f32 %v1374_v30, %v1374_v30  ;;  %1073 = vmatprep.subr.bf16.mxu1 %v1181_v3 }
 0x382   :  { %793 = vmatpush2.bf16.msra.mxu0 %v1178_v4 }
 0x383   :  { %v372_v34 = vadd.f32 %v368_v33, %v367_v32 }
 0x384   :  { %1074 = vmatpush3.bf16.msra.mxu1 %v1182_v5 }
 0x385   :  { %373 = vadd.xlane.f32.xlu1 %v372_v34 }
 0x40a   :  { %v371_v6 = vpop.xlane.xlu0 %370 }
 0x40b   :  { %v375_v7 = vmul.f32 0.00390625, %v371_v6 }
 0x40d   :  { %v377_v8 = vadd.f32 1e-05, %v375_v7 }
 0x40e   :  { %v374_v9 = vpop.xlane.xlu1 %373 }
 0x40f   :  { %1187 = vrsqrt.f32 %v377_v8  ;;  %v376_v10 = vmul.f32 0.00390625, %v374_v9 }
 0x411   :  { %v378_v11 = vadd.f32 1e-05, %v376_v10 }
 0x413   :  { %1189 = vrsqrt.f32 %v378_v11 }
 0x41c   :  { %v1188_v15 = vpop.eup %1187 }
 0x41d   :  { %v382_v17 = vmul.f32 %v1188_v15, %v1366_v24  ;;  %v381_v18 = vmul.f32 %v1188_v15, %v1364_v23 }
 0x41f   :  { %v397_v19 = vmul.f32 %v393_v14, %v382_v17  ;;  %v396_v22 = vmul.f32 %v389_v13, %v381_v18 }
 0x420   :  { %v1190_v25 = vpop.eup %1189 }
 0x421   :  { %v384_v26 = vmul.f32 %v1190_v25, %v1374_v30  ;;  %v383_v27 = vmul.f32 %v1190_v25, %v1372_v29  ;;  %v412_v31 = vadd.f32 %v408_v21, %v397_v19  ;;  %v411_v33 = vadd.f32 %v404_v20, %v396_v22  ;;  %v419_v29 = vld [vmem:[%s1427_s6] ss:$4 sm:$0x7] }
 0x422   :  { %v1398_v30 = vsub.s32 2, %v1351_v53  ;;  %v494_v40 = vrot.slane %v419_v29, %v1354_v54  ;;  %v498_v41 = vrot.slane %v419_v29, %v1357_v55 }
 0x423   :  { %v399_v28 = vmul.f32 %v393_v14, %v384_v26  ;;  %v398_v32 = vmul.f32 %v389_v13, %v383_v27  ;;  %v416_v24 = vmax.f32 %v412_v31, 0.0  ;;  %v415_v23 = vmax.f32 %v411_v33, 0.0  ;;  %v998_v31 = vld [vmem:[%s1427_s6 + $0x1] ss:$4 sm:$0x7] }
 0x424   :  { %v502_v44 = vrot.slane %v419_v29, %v1398_v30  ;;  %v901_v33 = vrot.slane %v998_v31, %v1398_v30 }
 0x425   :  { %v414_v34 = vadd.f32 %v408_v21, %v399_v28  ;;  %v413_v35 = vadd.f32 %v404_v20, %v398_v32  ;;  %v999_v32 = vld [vmem:[%s1427_s6 + $0x2] ss:$4 sm:$0x7]  ;;  %s1289_s6 = smov [#allocation8]  }
 0x426   :  { %v923_v29 = vrot.slane %v999_v32, %v1398_v30  ;;  %s962_s9 = sshll.u32 %s1289_s6, 4  ;;  %s963_s9 = int_to_ptr.vmem [resolvable:$true] %s962_s9 }
 0x427   :  { %v418_v36 = vmax.f32 %v414_v34, 0.0  ;;  %v417_v37 = vmax.f32 %v413_v35, 0.0  ;;  %v893_v34 = vrot.slane %v998_v31, %v1354_v54  ;;  %v897_v35 = vrot.slane %v998_v31, %v1357_v55  ;;  %s1255_s10 = scalar_lea.vmem %s963_s9, 384  ;;  %p1260_p2 = scmp.lt.s32.totalorder %s963_s9, %s963_s9 }
 0x428   :  { %p1256_p1 = scmp.ne.s32.totalorder %s963_s9, %s1255_s10  ;;  %p1261_p3 = scmp.lt.s32.totalorder %s1255_s10, %s1255_s10 }
 0x429   :  { %v425_v38 = vpack.c.bf16 %v418_v36, %v416_v24  ;;  %v424_v39 = vpack.c.bf16 %v417_v37, %v415_v23 }
 0x42a   :  { %p1262_p4 = por %p1261_p3, %p1260_p2 }
 0x42b   :  { %794 = vmatprep.mubr.bf16.mxu0 %v425_v38  ;;  %837 = vmatprep.mubr.bf16.mxu1 %v425_v38  ;;  %v915_v38 = vrot.slane %v999_v32, %v1354_v54 }
 0x42c   :  { %795 = vmatmul.mubr.bf16.vlgmr.msra.gmra.mxu0 %v424_v39  ;;  %838 = vmatmul.mubr.bf16.vlgmr.msra.gmra.mxu1 %v424_v39  ;;  %v919_v39 = vrot.slane %v999_v32, %v1357_v55  ;;  %p1263_p5 = pnand %p1262_p4, %p1256_p1 }
 0x4ec   :  { %v796_v42 = vpop.f32.mrf.mxu0  ;;  %v1075_v43 = vpop.f32.mrf.mxu1 }
 0x4ed   :  { %v797_v47 = vadd.f32 %v796_v42, %v494_v40 }
 0x4ee   :  { %v798_v45 = vpop.f32.mrf.mxu0  ;;  %v1076_v46 = vpop.f32.mrf.mxu1 }
 0x4ef   :  { %v799_v48 = vadd.f32 %v798_v45, %v498_v41  ;;  %v1077_v49 = vadd.f32 %v1076_v46, %v1075_v43 }
 0x4f0   :  { %v800_v50 = vpop.f32.mrf.mxu0  ;;  %v1078_v51 = vpop.f32.mrf.mxu1 }
 0x4f1   :  { %v846_v52 = vadd.f32 %v799_v48, %v797_v47  ;;  %v840_v56 = vadd.f32 %v1077_v49, %v502_v44  ;;  %v801_v58 = vadd.f32 %v800_v50, %v494_v40 }
 0x4f2   :  { %v802_v57 = vpop.f32.mrf.mxu0  ;;  %v1079_v53 = vpop.f32.mrf.mxu1 }
 0x4f3   :  { %v803_v59 = vadd.f32 %v802_v57, %v498_v41  ;;  %v1080_v60 = vadd.f32 %v1079_v53, %v1078_v51  ;;  %v847_v61 = vadd.f32 %v846_v52, %v840_v56 }
 0x4f5   :  { %v850_v62 = vadd.f32 %v803_v59, %v801_v58  ;;  %v843_v63 = vadd.f32 %v1080_v60, %v502_v44  ;;  %848 = vadd.xlane.f32.xlu0 %v847_v61 }
 0x4f7   :  { %v851_v0 = vadd.f32 %v850_v62, %v843_v63 }
 0x4f9   :  { %852 = vadd.xlane.f32.xlu1 %v851_v0 }
 0x57e   :  { %v849_v1 = vpop.xlane.xlu0 %848 }
 0x57f   :  { %v855_v2 = vmul.f32 0.0026041667, %v849_v1 }
 0x581   :  { %v857_v3 = vsub.f32 %v797_v47, %v855_v2  ;;  %v858_v4 = vsub.f32 %v799_v48, %v855_v2  ;;  %v859_v5 = vsub.f32 %v840_v56, %v855_v2 }
 0x582   :  { %v853_v6 = vpop.xlane.xlu1 %852 }
 0x583   :  { %v856_v7 = vmul.f32 0.0026041667, %v853_v6  ;;  %v863_v8 = vmul.f32 %v857_v3, %v857_v3  ;;  %v864_v9 = vmul.f32 %v858_v4, %v858_v4  ;;  %v865_v10 = vmul.f32 %v859_v5, %v859_v5 }
 0x585   :  { %v860_v11 = vsub.f32 %v801_v58, %v856_v7  ;;  %v861_v12 = vsub.f32 %v803_v59, %v856_v7  ;;  %v862_v13 = vsub.f32 %v843_v63, %v856_v7  ;;  %v869_v14 = vadd.f32 %v864_v9, %v863_v8 }
 0x587   :  { %v870_v15 = vadd.f32 %v869_v14, %v865_v10  ;;  %v866_v16 = vmul.f32 %v860_v11, %v860_v11  ;;  %v867_v17 = vmul.f32 %v861_v12, %v861_v12  ;;  %v868_v18 = vmul.f32 %v862_v13, %v862_v13 }
 0x589   :  { %871 = vadd.xlane.f32.xlu0 %v870_v15  ;;  %v873_v19 = vadd.f32 %v867_v17, %v866_v16 }
 0x58b   :  { %v874_v20 = vadd.f32 %v873_v19, %v868_v18 }
 0x58d   :  { %875 = vadd.xlane.f32.xlu1 %v874_v20 }
 0x612   :  { %v872_v21 = vpop.xlane.xlu0 %871 }
 0x613   :  { %v877_v22 = vmul.f32 0.0026041667, %v872_v21 }
 0x615   :  { %v879_v25 = vadd.f32 1e-05, %v877_v22 }
 0x616   :  { %v876_v26 = vpop.xlane.xlu1 %875 }
 0x617   :  { %1191 = vrsqrt.f32 %v879_v25  ;;  %v878_v27 = vmul.f32 0.0026041667, %v876_v26 }
 0x619   :  { %v880_v28 = vadd.f32 1e-05, %v878_v27 }
 0x61b   :  { %1193 = vrsqrt.f32 %v880_v28 }
 0x624   :  { %v1192_v24 = vpop.eup %1191 }
 0x625   :  { %v883_v36 = vmul.f32 %v1192_v24, %v857_v3  ;;  %v884_v23 = vmul.f32 %v1192_v24, %v858_v4  ;;  %v885_v37 = vmul.f32 %v1192_v24, %v859_v5 }
 0x627   :  { %v905_v40 = vmul.f32 %v893_v34, %v883_v36  ;;  %v906_v41 = vmul.f32 %v897_v35, %v884_v23  ;;  %v907_v42 = vmul.f32 %v901_v33, %v885_v37 }
 0x628   :  { %v1194_v43 = vpop.eup %1193 }
 0x629   :  { %v886_v44 = vmul.f32 %v1194_v43, %v860_v11  ;;  %v887_v45 = vmul.f32 %v1194_v43, %v861_v12  ;;  %v888_v46 = vmul.f32 %v1194_v43, %v862_v13  ;;  %v927_v47 = vadd.f32 %v915_v38, %v905_v40 }
 0x62a   :  { %v928_v48 = vadd.f32 %v919_v39, %v906_v41  ;;  %v929_v49 = vadd.f32 %v923_v29, %v907_v42 }
 0x62b   :  { %v908_v50 = vmul.f32 %v893_v34, %v886_v44  ;;  %v909_v51 = vmul.f32 %v897_v35, %v887_v45  ;;  %v910_v52 = vmul.f32 %v901_v33, %v888_v46 }
 0x62c   :  { %v1052_v56 = vpack.c.bf16 %v928_v48, %v927_v47  ;;  %v1053_v57 = vpack.c.bf16 %v929_v49, %v929_v49 }
 0x62d   :  { %v930_v54 = vadd.f32 %v915_v38, %v908_v50  ;;  %v931_v55 = vadd.f32 %v919_v39, %v909_v51  ;;  %v932_v30 = vadd.f32 %v923_v29, %v910_v52 }
 0x62e   :  { %953 = vst [vmem:[#allocation8] sm:$0xff] %v1052_v56  ;;  %954 = vst [vmem:[#allocation8 + $0x8] sm:$0xf] %v1053_v57 }
 0x62f   :  { %v1054_v53 = vpack.c.bf16 %v931_v55, %v930_v54  ;;  %v1055_v58 = vpack.c.bf16 %v932_v30, %v932_v30 }
 0x631   :  { %955 = vst [vmem:[#allocation8 + $0xc] sm:$0xff] %v1054_v53  ;;  %956 = vst [vmem:[#allocation8 + $0x14] sm:$0xf] %v1055_v58 }
 0x632   :  { %1266 = shalt.err (!%p1263_p5)
}
 0x633   :  { %968 = dma.vmem_to_hbm [thread:$0]  %s963_s9, 384, %s1428_s7, [#allocation4], %s1286_s3, %s1286_s3, %s1287_s16  }
 0x634   :  { %1279 = dma.done.wait [#allocation4], 384  }
 0x635   :  { %1280 = vsyncadd [#allocation4], 4294966912 }
 0x636   :  { %972 = vsyncpa [#allocation3], 1 }
 0x637   :  { %973 = vsyncpa [#allocation6], 1 }
 0x638   :  { %974 = vsyncpa [#allocation4], 1 }

</bundles_post_ra>
